<compile_context>
chip_gen: v6e
topology: v6e:2x2x1
jax: 0.10.0
libtpu: 0.0.40
codegen_flags: <defaults>
</compile_context>

<pallas_src>
import functools

import jax
import jax.numpy as jnp
from jax.experimental import pallas as pl
from jax.experimental.pallas import tpu as pltpu


def _cdiv(a, b):
    return -(-a // b)


def af_kernel(x_ref, snr_ref, w1c_ref, w1s_ref, b1_ref, w2_ref, b2_ref, o_ref,
              *, inv_hw):
    # x_ref: (Bt, C, HW) tile, HW lane-dense.  All math below is per batch row,
    # so a partial trailing grid block (stale/garbage rows, masked store) is
    # harmless.
    x = x_ref[...]

    # ---- mean over spatial: f32 accumulation, no materialized f32 tile copy --
    ctx = jnp.sum(x, axis=-1, dtype=jnp.float32) * inv_hw        # (Bt, C)

    # ---- Linear(C+1 -> C): split into ctx part + snr part (== concat) -------
    snr = snr_ref[...].reshape(snr_ref.shape[0], 1).astype(jnp.float32)  # (Bt,1)
    h = (jnp.dot(ctx, w1c_ref[...], preferred_element_type=jnp.float32)
         + snr * w1s_ref[...]                                    # (Bt,1)*(1,C)
         + b1_ref[...])                                          # (Bt, C)

    # ---- LeakyReLU (negative_slope = 0.01, PyTorch default) -----------------
    h = jnp.where(h > 0, h, 0.01 * h)

    # ---- Linear(C -> C) + Sigmoid (EUP exp) ----------------------------------
    a = jax.nn.sigmoid(
        jnp.dot(h, w2_ref[...], preferred_element_type=jnp.float32)
        + b2_ref[...])                                           # (Bt, C)

    # ---- broadcast-multiply attention mask over spatial (input dtype) -------
    o_ref[...] = x * a.astype(x.dtype)[:, :, None]


def _pick_bt(B, vmem_bytes_per_elem, target_tile_bytes,
             min_tile_bytes=512 << 10, min_steps=4):
    """Batch-tile size: as large as fits `target_tile_bytes`, but prefer at
    least `min_steps` grid steps (>= 2 per TensorCore on dual-TC chips) and an
    even step count, as long as the per-step tile stays reasonably large."""
    bt = max(1, min(B, target_tile_bytes // max(1, vmem_bytes_per_elem)))
    steps = _cdiv(B, bt)
    if steps < min_steps:
        bt_small = max(1, _cdiv(B, min_steps))
        if bt_small * vmem_bytes_per_elem >= min_tile_bytes:
            bt = bt_small
        elif steps < 2 and B >= 2:
            bt = _cdiv(B, 2)          # at least give both cores one step each
    steps = _cdiv(B, bt)
    if steps > 1 and steps % 2 == 1:   # prefer an even step count (2 TCs)
        bt_even = max(1, _cdiv(B, steps + 1))
        if bt_even * vmem_bytes_per_elem >= min_tile_bytes:
            bt = bt_even
    return bt


def af_module_forward(x, snr, w1, b1, w2, b2, *, target_tile_bytes=None):
    """x: (B, C, H, W), snr: (Bs, 1) with B % Bs == 0.
    w1: (C+1, C), b1: (C,), w2: (C, C), b2: (C,)  (y = x @ W + b layout)."""
    B, C, H, W = x.shape
    if B % snr.shape[0] != 0:
        raise ValueError("batch must be divisible by snr batch")
    HW = H * W
    itemsize = jnp.dtype(x.dtype).itemsize

    # ---- generation-aware VMEM budget / tile target --------------------------
    try:
        vmem_cap = int(pltpu.get_tpu_info().vmem_capacity_bytes)   # 64 MiB v7x, 128 MiB v5e/v6e
    except Exception:
        vmem_cap = 64 << 20                                        # conservative fallback
    vmem_budget = max(24 << 20, vmem_cap - (8 << 20))              # leave headroom
    if target_tile_bytes is None:
        # in + out tiles, each double-buffered => ~4x tile resident, plus slack
        target_tile_bytes = max(1 << 20, (vmem_budget - (4 << 20)) // 5)

    # VMEM footprint per batch element accounts for sublane (C -> 8/16/32) and
    # lane (HW -> 128) padding of the tiled layout, so raising tiles can't OOM.
    sublane = 8 * max(1, 4 // itemsize)
    c_pad = _cdiv(C, sublane) * sublane
    hw_pad = _cdiv(HW, 128) * 128
    vmem_bytes_per_elem = c_pad * hw_pad * itemsize

    Bt = _pick_bt(B, vmem_bytes_per_elem, target_tile_bytes)
    grid = (_cdiv(B, Bt),)

    tile_bytes = Bt * vmem_bytes_per_elem
    weight_bytes = (2 * C * C + 3 * C + 1) * 4
    vmem_limit = int(min(vmem_cap,
                         max(vmem_budget, 4 * tile_bytes + 2 * weight_bytes + (2 << 20))))

    # ---- wrapper glue (all free reshapes, no HBM copies) ----------------------
    x3 = x.reshape(B, C, HW)                          # no padding / no extra HBM pass
    snr_rep = jnp.repeat(snr, B // snr.shape[0], axis=0).reshape(B, 1, 1)
    w1c = w1[:C, :]                                   # (C, C)  ctx rows
    w1s = w1[C:, :].reshape(1, C)                     # (1, C)  snr row
    b1_2d = b1.reshape(1, C)
    b2_2d = b2.reshape(1, C)

    kernel = functools.partial(af_kernel, inv_hw=1.0 / HW)

    cost = pl.CostEstimate(
        flops=int(2 * B * C * (C + 1) + 2 * B * C * C + 2 * B * C * HW),
        transcendentals=int(B * C),
        bytes_accessed=int(2 * B * C * HW * itemsize + weight_bytes),
    )

    out3 = pl.pallas_call(
        kernel,
        out_shape=jax.ShapeDtypeStruct((B, C, HW), x.dtype),
        grid=grid,
        in_specs=[
            pl.BlockSpec((Bt, C, HW), lambda i: (i, 0, 0)),   # x tile (Bt elems)
            pl.BlockSpec((Bt, 1, 1), lambda i: (i, 0, 0)),    # snr per batch elem
            pl.BlockSpec((C, C), lambda i: (0, 0)),           # W1 (ctx rows)
            pl.BlockSpec((1, C), lambda i: (0, 0)),           # W1 (snr row)
            pl.BlockSpec((1, C), lambda i: (0, 0)),           # b1
            pl.BlockSpec((C, C), lambda i: (0, 0)),           # W2
            pl.BlockSpec((1, C), lambda i: (0, 0)),           # b2
        ],
        out_specs=pl.BlockSpec((Bt, C, HW), lambda i: (i, 0, 0)),
        compiler_params=pltpu.CompilerParams(
            dimension_semantics=("parallel",),
            vmem_limit_bytes=vmem_limit),
        cost_estimate=cost,
    )(x3, snr_rep, w1c, w1s, b1_2d, w2, b2_2d)

    return out3.reshape(B, C, H, W)


def af_module_reference(x, snr, w1, b1, w2, b2):
    B, C, H, W = x.shape
    ctx = jnp.mean(x, axis=(2, 3))                                # (B, C)
    snr_rep = jnp.repeat(snr, B // snr.shape[0], axis=0)          # (B, 1)
    ci = jnp.concatenate([ctx, snr_rep], axis=1)                  # (B, C+1)
    h = ci @ w1 + b1
    h = jnp.where(h > 0, h, 0.01 * h)
    a = jax.nn.sigmoid(h @ w2 + b2)
    return x * a[:, :, None, None]


if __name__ == "__main__":
    B, C, H, W = 2, 4, 16, 16

    key = jax.random.PRNGKey(0)
    kx, ks, k1, k2, k3, k4 = jax.random.split(key, 6)

    x = jax.random.normal(kx, (B, C, H, W), dtype=jnp.float32)
    snr = jax.random.normal(ks, (B, 1), dtype=jnp.float32)        # one snr per batch elem

    # deterministic parameter init (Linear: y = x @ W + b, W stored as (in, out))
    w1 = jax.random.normal(k1, (C + 1, C), dtype=jnp.float32) * 0.3
    b1 = jax.random.normal(k2, (C,), dtype=jnp.float32) * 0.1
    w2 = jax.random.normal(k3, (C, C), dtype=jnp.float32) * 0.3
    b2 = jax.random.normal(k4, (C,), dtype=jnp.float32) * 0.1

    out = af_module_forward(x, snr, w1, b1, w2, b2)
    out = jax.block_until_ready(out)

    ref = af_module_reference(x, snr, w1, b1, w2, b2)
    assert out.shape == (B, C, H, W)
    assert jnp.allclose(out, ref, atol=1e-5, rtol=1e-5), "mismatch vs reference"

    print("KERNEL_OK")
</pallas_src>

<mosaic_0001>
module attributes {stable_mosaic.version = 11 : i64} {
  func.func @af_kernel(%arg0: i32, %arg1: memref<1x4x256xf32, #tpu.memory_space<vmem>>, %arg2: memref<1x1x1xf32, #tpu.memory_space<vmem>>, %arg3: memref<4x4xf32, #tpu.memory_space<vmem>>, %arg4: memref<1x4xf32, #tpu.memory_space<vmem>>, %arg5: memref<1x4xf32, #tpu.memory_space<vmem>>, %arg6: memref<4x4xf32, #tpu.memory_space<vmem>>, %arg7: memref<1x4xf32, #tpu.memory_space<vmem>>, %arg8: memref<1x4x256xf32, #tpu.memory_space<vmem>>) attributes {dimension_semantics = [#tpu.dimension_semantics<parallel>], iteration_bounds = array<i64: 2>, scalar_prefetch = 0 : i64, scratch_operands = 0 : i64, tpu.core_type = #tpu.core_type<tc>, window_params = [{transform_indices = @transform_0, window_bounds = array<i64: 1, 4, 256>}, {transform_indices = @transform_1, window_bounds = array<i64: 1, 1, 1>}, {pipeline_mode = #tpu.pipeline_mode<synchronous>, transform_indices = @transform_2, window_bounds = array<i64: 4, 4>}, {pipeline_mode = #tpu.pipeline_mode<synchronous>, transform_indices = @transform_3, window_bounds = array<i64: 1, 4>}, {pipeline_mode = #tpu.pipeline_mode<synchronous>, transform_indices = @transform_4, window_bounds = array<i64: 1, 4>}, {pipeline_mode = #tpu.pipeline_mode<synchronous>, transform_indices = @transform_5, window_bounds = array<i64: 4, 4>}, {pipeline_mode = #tpu.pipeline_mode<synchronous>, transform_indices = @transform_6, window_bounds = array<i64: 1, 4>}, {transform_indices = @transform_7, window_bounds = array<i64: 1, 4, 256>}]} {
    %c0 = arith.constant 0 : index
    %c0_0 = arith.constant 0 : index
    %c0_1 = arith.constant 0 : index
    %0 = vector.load %arg1[%c0, %c0_0, %c0_1] : memref<1x4x256xf32, #tpu.memory_space<vmem>>, vector<1x4x256xf32>
    %cst = arith.constant dense<0.000000e+00> : vector<1x4xf32>
    %1 = vector.multi_reduction <add>, %0, %cst [2] : vector<1x4x256xf32> to vector<1x4xf32>
    %cst_2 = arith.constant 3.906250e-03 : f32
    %2 = vector.broadcast %cst_2 : f32 to vector<1x4xf32>
    %3 = arith.mulf %1, %2 : vector<1x4xf32>
    %c0_3 = arith.constant 0 : index
    %c0_4 = arith.constant 0 : index
    %c0_5 = arith.constant 0 : index
    %4 = vector.load %arg2[%c0_3, %c0_4, %c0_5] : memref<1x1x1xf32, #tpu.memory_space<vmem>>, vector<1x1x1xf32>
    %5 = vector.shape_cast %4 : vector<1x1x1xf32> to vector<1x1xf32>
    %c0_6 = arith.constant 0 : index
    %c0_7 = arith.constant 0 : index
    %6 = vector.load %arg3[%c0_6, %c0_7] : memref<4x4xf32, #tpu.memory_space<vmem>>, vector<4x4xf32>
    %cst_8 = arith.constant dense<0.000000e+00> : vector<1x4xf32>
    %7 = tpu.matmul %3, %6, %cst_8 {dimension_numbers = #tpu.dot_dimension_numbers<[1], [0], [0], [1], [0, 0, 1, 1], [], []>} : vector<1x4xf32>, vector<4x4xf32>, vector<1x4xf32> -> vector<1x4xf32>
    %c0_9 = arith.constant 0 : index
    %c0_10 = arith.constant 0 : index
    %8 = vector.load %arg4[%c0_9, %c0_10] : memref<1x4xf32, #tpu.memory_space<vmem>>, vector<1x4xf32>
    %9 = vector.broadcast %5 : vector<1x1xf32> to vector<1x4xf32>
    %10 = arith.mulf %9, %8 : vector<1x4xf32>
    %11 = arith.addf %7, %10 : vector<1x4xf32>
    %c0_11 = arith.constant 0 : index
    %c0_12 = arith.constant 0 : index
    %12 = vector.load %arg5[%c0_11, %c0_12] : memref<1x4xf32, #tpu.memory_space<vmem>>, vector<1x4xf32>
    %13 = arith.addf %11, %12 : vector<1x4xf32>
    %cst_13 = arith.constant 0.000000e+00 : f32
    %14 = vector.broadcast %cst_13 : f32 to vector<1x4xf32>
    %15 = arith.cmpf ogt, %13, %14 : vector<1x4xf32>
    %cst_14 = arith.constant 0.00999999977 : f32
    %16 = vector.broadcast %cst_14 : f32 to vector<1x4xf32>
    %17 = arith.mulf %16, %13 : vector<1x4xf32>
    %18 = arith.select %15, %13, %17 : vector<1x4xi1>, vector<1x4xf32>
    %c0_15 = arith.constant 0 : index
    %c0_16 = arith.constant 0 : index
    %19 = vector.load %arg6[%c0_15, %c0_16] : memref<4x4xf32, #tpu.memory_space<vmem>>, vector<4x4xf32>
    %cst_17 = arith.constant dense<0.000000e+00> : vector<1x4xf32>
    %20 = tpu.matmul %18, %19, %cst_17 {dimension_numbers = #tpu.dot_dimension_numbers<[1], [0], [0], [1], [0, 0, 1, 1], [], []>} : vector<1x4xf32>, vector<4x4xf32>, vector<1x4xf32> -> vector<1x4xf32>
    %c0_18 = arith.constant 0 : index
    %c0_19 = arith.constant 0 : index
    %21 = vector.load %arg7[%c0_18, %c0_19] : memref<1x4xf32, #tpu.memory_space<vmem>>, vector<1x4xf32>
    %22 = arith.addf %20, %21 : vector<1x4xf32>
    %23 = arith.negf %22 : vector<1x4xf32>
    %24 = math.exp %23 : vector<1x4xf32>
    %cst_20 = arith.constant 1.000000e+00 : f32
    %25 = vector.broadcast %cst_20 : f32 to vector<1x4xf32>
    %26 = arith.addf %25, %24 : vector<1x4xf32>
    %27 = arith.divf %25, %26 : vector<1x4xf32>
    %28 = vector.shape_cast %27 : vector<1x4xf32> to vector<1x4x1xf32>
    %29 = vector.broadcast %28 : vector<1x4x1xf32> to vector<1x4x256xf32>
    %30 = arith.mulf %0, %29 : vector<1x4x256xf32>
    %c0_21 = arith.constant 0 : index
    %c0_22 = arith.constant 0 : index
    %c0_23 = arith.constant 0 : index
    %31 = vector.load %arg8[%c0_21, %c0_22, %c0_23] : memref<1x4x256xf32, #tpu.memory_space<vmem>>, vector<1x4x256xf32>
    tpu.vector_store %arg8[%c0_21, %c0_22, %c0_23], %30 {strides = array<i32>} : memref<1x4x256xf32, #tpu.memory_space<vmem>>, vector<1x4x256xf32>,
    return
  }
  func.func @transform_0(%arg0: i32) -> (i32, i32, i32) {
    %c0_i32 = arith.constant 0 : i32
    %c0_i32_0 = arith.constant 0 : i32
    %c0_i32_1 = arith.constant 0 : i32
    return %arg0, %c0_i32, %c0_i32_0 : i32, i32, i32
  }
  func.func @transform_1(%arg0: i32) -> (i32, i32, i32) {
    %c0_i32 = arith.constant 0 : i32
    %c0_i32_0 = arith.constant 0 : i32
    %c0_i32_1 = arith.constant 0 : i32
    return %arg0, %c0_i32, %c0_i32_0 : i32, i32, i32
  }
  func.func @transform_2(%arg0: i32) -> (i32, i32) {
    %c0_i32 = arith.constant 0 : i32
    %c0_i32_0 = arith.constant 0 : i32
    %c0_i32_1 = arith.constant 0 : i32
    return %c0_i32, %c0_i32_0 : i32, i32
  }
  func.func @transform_3(%arg0: i32) -> (i32, i32) {
    %c0_i32 = arith.constant 0 : i32
    %c0_i32_0 = arith.constant 0 : i32
    %c0_i32_1 = arith.constant 0 : i32
    return %c0_i32, %c0_i32_0 : i32, i32
  }
  func.func @transform_4(%arg0: i32) -> (i32, i32) {
    %c0_i32 = arith.constant 0 : i32
    %c0_i32_0 = arith.constant 0 : i32
    %c0_i32_1 = arith.constant 0 : i32
    return %c0_i32, %c0_i32_0 : i32, i32
  }
  func.func @transform_5(%arg0: i32) -> (i32, i32) {
    %c0_i32 = arith.constant 0 : i32
    %c0_i32_0 = arith.constant 0 : i32
    %c0_i32_1 = arith.constant 0 : i32
    return %c0_i32, %c0_i32_0 : i32, i32
  }
  func.func @transform_6(%arg0: i32) -> (i32, i32) {
    %c0_i32 = arith.constant 0 : i32
    %c0_i32_0 = arith.constant 0 : i32
    %c0_i32_1 = arith.constant 0 : i32
    return %c0_i32, %c0_i32_0 : i32, i32
  }
  func.func @transform_7(%arg0: i32) -> (i32, i32, i32) {
    %c0_i32 = arith.constant 0 : i32
    %c0_i32_0 = arith.constant 0 : i32
    %c0_i32_1 = arith.constant 0 : i32
    return %arg0, %c0_i32, %c0_i32_0 : i32, i32, i32
  }
}

</mosaic_0001>

<bundles_post_ra>
// kernel: tpu_custom_call.1
= control target key start
LH: loop header
LB: loop body
LE: loop exit
PB: predicated region body
PF: predicated region fallthrough
CT: control target
= control target key end

     0   :  { %s1114_s0 = inlined_call_operand.hbm [shape: f32[2,4,256], index: 0, kind: input, shape index: {}]   ;;  %s1115_s1 = inlined_call_operand.vmem [shape: f32[2,1,1], index: 1, kind: input, shape index: {}]   ;;  %s1116_s2 = inlined_call_operand.vmem [shape: f32[4,4], index: 2, kind: input, shape index: {}]   ;;  %s1117_s3 = inlined_call_operand.hbm [shape: f32[1,4], index: 3, kind: input, shape index: {}]   ;;  %s1118_s4 = inlined_call_operand.vmem [shape: f32[1,4], index: 4, kind: input, shape index: {}]   ;;  %s1119_s5 = inlined_call_operand.vmem [shape: f32[4,4], index: 5, kind: input, shape index: {}]   ;;  %s1120_s6 = inlined_call_operand.vmem [shape: f32[1,4], index: 6, kind: input, shape index: {}]   ;;  %s1121_s7 = inlined_call_operand.hbm [shape: f32[2,4,256], index: 7, kind: output, shape index: {}]  }
   0x1   :  { %1126 = sst [smem:[#allocation12_spill]] %s1117_s3 }
   0x2   :  { %12 = vsyncpa [#allocation3], 0 }
   0x3   :  { %14 = vsyncpa [#allocation3 + $0x1], 0 }
   0x4   :  { %15 = vsyncpa [#allocation6], 0 }
   0x5   :  { %16 = vsyncpa [#allocation4], 0 }
   0x6   :  { %18 = vsyncpa [#allocation4 + $0x1], 0  ;;  %s915_s24 = smov 0   ;;  %s917_s25 = smov 0  }
   0x7   :  { %s919_s26 = smov 0   ;;  %s921_s27 = smov 0  }
   0x8 LB: > { %s936_s28 = sadd.s32 4294967295, %s866_s27   ;;  %s640_s29 = sadd.s32 4294967294, %s866_s27   ;;  %s866_s27 = sphi %s921_s27, %s1148_s27   ;;  %s862_s26 = sphi %s919_s26, %s1147_s26   ;;  %s858_s25 = sphi %s917_s25, %s1146_s25   ;;  %s854_s24 = sphi %s915_s24, %s1145_s24  }
   0x9   : > { %p44_p0 = scmp.ne.s32.totalorder %s858_s25, %s854_s24  ;;  %p1122_p1 = scmp.eq.s32.totalorder %s936_s28, 0 }
   0xa   : > { %p205_p3 = scmp.eq.s32.totalorder %s640_s29, 1  ;;  %p641_p5 = scmp.ge.s32.totalorder %s866_s27, 1 }
   0xb   : > { %p945_p4 = por %p1122_p1, %p44_p0  ;;  %p212_p7 = scmp.lt.s32.totalorder %s866_s27, 3 }
   0xc   : > { %p950_p6 = por %p205_p3, %p44_p0  ;;  %s868_s10 = smov [#allocation5]  }
   0xd   : > { %s1127_s30 = scalar_select %p945_p4, 1, 0 }
   0xe   : > { %s1128_s8 = scalar_select %p950_p6, 1, 0 }
   0xf   : > { %p955_p8 = pnand %p641_p5, %p212_p7  ;;  %s228_s11 = sshll.u32 %s868_s10, 4  ;;  %s229_s11 = int_to_ptr.vmem [resolvable:$true] %s228_s11 }
  0x10   : > { %s963_s12 = sadd.s32 1, %s866_s27   ;;  %s31_s16 = sadd.s32 1, %s862_s26 }
  0x11   : > { %s1129_s9 = scalar_select %p955_p8, 1, 0 }
  0x12   : > { %p685_p10 = pneg %p955_p8  ;;  %s28_s14 = ssub.s32 %s866_s27, %s963_s12 }
  0x13   : > { %p973_p12 = scmp.eq.s32.totalorder %s28_s14, 0  ;;  %p38_p13 = scmp.ne.s32.totalorder %s862_s26, %s858_s25 }
  0x14   : > { %p967_p11 = pnand %p685_p10, %p1122_p1  ;;  %s755_s17 = scalar_lea.vmem %s229_s11, 16 }
  0x15   : > { %p756_p3 = scmp.ne.s32.totalorder %s229_s11, %s755_s17  ;;  %s762_s18 = scalar_lea.vmem %s229_s11, 32 }
  0x16   : > { %p746_p0 = pneg %p967_p11  ;;  %p763_p9 = scmp.lt.s32.totalorder %s229_s11, %s229_s11 }
  0x17   : > { %p764_p10 = scmp.lt.s32.totalorder %s762_s18, %s755_s17 }
  0x18   : > { %p758_p5 = pnand %p756_p3, %p746_p0 }
  0x19   : > { %p765_p1 = por %p764_p10, %p763_p9 }
  0x1a   : > { %p759_p7 = pneg %p758_p5 }
  0x1c   : > { %p766_p2 = pnand %p765_p1, %p759_p7 }
  0x1e   : > { %769 = shalt.err (!%p766_p2)
}
  0x1f   : > { %s1132_s3 = sld [smem:[#allocation12_spill]]  ;;  %p39_p1 = scmp.eq.s32.totalorder %s866_s27, 0 }
  0x20   : > { %s990_s21 = scalar_select %p973_p12, %s862_s26, %s31_s16  }
  0x21   : > { %p1134_p2 = scmp.eq.s32.totalorder %s936_s28, 1  ;;  %p698_p0 = scmp.lt.s32.totalorder %s866_s27, 2 }
  0x22   : > { %1133 = sst [smem:[#allocation11_spill]] %s990_s21  ;;  %s248_s23 = sand.u32 1, %s862_s26  }
  0x23   : > { %p998_p9 = por %p1134_p2, %p38_p13  ;;  %p40_p3 = por %p39_p1, %p38_p13 }
  0x24   : > { %s644_s29 = sshll.u32 %s248_s23, 3  ;;  %s661_s10 = sshll.u32 %s866_s27, 7 }
  0x25   : > { %688 = dma.hbm_to_vmem [thread:$0]  (!%p967_p11), %s1132_s3, 16, %s229_s11, [#allocation6]  }
  0x26   : > { %s1135_s22 = scalar_select %p998_p9, 1, 0 }
  0x27   : > { %s1011_s11 = scalar_lea.hbm %s1114_s0, %s661_s10  ;;  %s252_s15 = scalar_lea.vmem [#allocation2], %s644_s29 }
  0x28   : > { %s260_s16 = sshll.u32 %s252_s15, 4  ;;  %p1013_p11 = pnand %p698_p0, %p40_p3  ;;  %s261_s16 = int_to_ptr.vmem [resolvable:$true] %s260_s16 }
  0x29   : > { %s249_s18 = scalar_lea.sflag [#allocation3], %s248_s23  ;;  %s770_s19 = scalar_lea.hbm %s1011_s11, 128 }
  0x2a   : > { %p771_p12 = scmp.ne.s32.totalorder %s1011_s11, %s770_s19  ;;  %p772_p13 = pneg %p1013_p11 }
  0x2b   : > { %s775_s13 = scalar_lea.hbm %s1114_s0, 256  ;;  %p776_p10 = scmp.lt.s32.totalorder %s1011_s11, %s1114_s0 }
  0x2c   : > { %p773_p5 = pnand %p772_p13, %p771_p12  ;;  %p777_p1 = scmp.lt.s32.totalorder %s775_s13, %s770_s19 }
  0x2e   : > { %p774_p7 = pneg %p773_p5  ;;  %p778_p2 = por %p777_p1, %p776_p10 }
  0x30   : > { %p779_p0 = pnand %p778_p2, %p774_p7 }
  0x32   : > { %782 = shalt.err (!%p779_p0)
}
  0x33   : > { %s783_s15 = scalar_lea.vmem %s261_s16, 128  ;;  %s869_s23 = smov [#allocation2]  }
  0x34   : > { %p784_p3 = scmp.ne.s32.totalorder %s261_s16, %s783_s15  ;;  %s788_s3 = sshll.u32 %s869_s23, 4  ;;  %s789_s3 = int_to_ptr.vmem [resolvable:$false] %s788_s3 }
  0x35   : > { %s790_s21 = scalar_lea.vmem %s789_s3, 256  ;;  %p791_p12 = scmp.lt.s32.totalorder %s261_s16, %s789_s3 }
  0x36   : > { %p786_p6 = pnand %p784_p3, %p772_p13  ;;  %p792_p5 = scmp.lt.s32.totalorder %s790_s21, %s783_s15 }
  0x38   : > { %p787_p9 = pneg %p786_p6  ;;  %p793_p4 = por %p792_p5, %p791_p12 }
  0x3a   : > { %p794_p8 = pnand %p793_p4, %p787_p9 }
  0x3c   : > { %797 = shalt.err (!%p794_p8)
}
  0x3d   : > { %692 = dma.hbm_to_vmem [thread:$0]  (!%p1013_p11), %s1011_s11, 128, %s261_s16, %s249_s18  }
  0x3e   : > { %p1137_p7 = scmp.ne.s32.totalorder %s1129_s9, 0 }
  0x3f   : > { %s1034_s19 = sand.u32 (!%p1137_p7), 1, %s858_s25   ;;  %p1138_p4 = scmp.ne.s32.totalorder (!%p1137_p7), %s1127_s30, 0 }
  0x40   : > { %275 = sbr.rel (%p1137_p7) target bundleno = 782 (0x30e), region = 48  ;;  %s648_s20 = sshll.u32 (!%p1137_p7), %s1034_s19, 3 }
  0x41   : > { %s278_s3 = scalar_lea.sflag (!%p1137_p7), [#allocation3], %s1034_s19  ;;  %s281_s21 = scalar_lea.vmem (!%p1137_p7), [#allocation2], %s648_s20 }
  0x45   : > { %841 = dma.done.wait (%p1138_p4), %s278_s3, 128  }
  0x46   : > { %843 = vsyncadd (%p1138_p4), %s278_s3, 4294967168  ;;  %p1139_p6 = scmp.eq.s32.totalorder %s936_s28, 0 }
  0x48   : > { %845 = dma.done.wait (%p1139_p6), [#allocation6], 16   ;;  %p1140_p8 = pmov %p1139_p6 }
  0x49   : > { %vm326_vm0 = vcmask 1043456   ;;  %v1048_v0 = vld [vmem:[%s281_s21] sm:$0xff]  ;;  %v870_v5 = vmov 0.0   ;;  %vm871_vm1 = vmmov 0   ;;  %p319_p9 = scmp.lt.s32.totalorder %s936_s28, 1  ;;  %v872_v7 = vmov 0  }
  0x4a   : > { %847 = vsyncadd (%p1140_p8), [#allocation6], 4294967280  ;;  %v324_v1 = vcombine.high %v1048_v0, %v1048_v0  ;;  %v327_v2 = vsel %vm326_vm0, %v1048_v0, 0.0  ;;  %667 = vmatprep.subr.mxu0 %v870_v5  ;;  %v334_v6 = vld [vmem:[%s1116_s2] sm:$0xf]  ;;  %672 = vmatprep.subr.mxu1 %v870_v5  ;;  %v341_v9 = vlaneseq  ;;  %vm353_vm2 = vcmask 31744  }
  0x4b   : > { %668 = vmatpush3.msk.msra.mxu0 %vm326_vm0, %v334_v6  ;;  %669 = vmatprep.mubr.msk.f32.mxu0 %vm871_vm1, %v870_v5  ;;  %s320_s11 = scalar_select %p319_p9, %s936_s28, 1  ;;  %v434_v16 = vld [vmem:[%s1119_s5] sm:$0xf]  ;;  %v335_v20 = vld [vmem:[#allocation5] sm:$0x1] }
  0x4c   : > { %v328_v3 = vsel %vm326_vm0, %v324_v1, 0.0  ;;  %674 = vmatprep.mubr.msk.f32.mxu1 %vm871_vm1, %v870_v5  ;;  %738 = vset.pattern.permute.xlu0 %v872_v7  ;;  %v342_v10 = vshrl.u32 %v341_v9, 7  ;;  %v348_v11 = vand.u32 127, %v341_v9  ;;  %v429_v23 = vld [vmem:[%s1118_s4] sm:$0x1]  ;;  %s662_s3 = sshll.u32 %s936_s28, 7 }
  0x4d   : > { %v329_v4 = vadd.f32 %v328_v3, %v327_v2  ;;  %s321_s18 = scalar_lea.vmem %s1115_s1, %s320_s11  ;;  %673 = vmatpush3.msk.msra.mxu1 %vm326_vm0, %v434_v16  ;;  %v435_v29 = vld [vmem:[%s1120_s6] sm:$0x1]  ;;  %v873_v38 = vmov 839922192   ;;  %s318_s21 = scalar_lea.vmem [#allocation7], %s648_s20 }
  0x4e   : > { %v333_v8 = vld [vmem:[%s321_s18] sm:$0x1]  ;;  %v351_v12 = vsub.s32 %v348_v11, %v342_v10  ;;  %v343_v17 = vsub.s32 0, %v342_v10  ;;  %v527_v39 = vunpack.c.l.s4 %v873_v38  ;;  %s551_s30 = sshll.u32 %s318_s21, 4  ;;  %s549_s16 = scalar_lea.hbm %s1121_s7, %s662_s3  ;;  %s552_s30 = int_to_ptr.vmem [resolvable:$true] %s551_s30 }
  0x4f   : > { %330 = vadd.xlane.f32.xlu0 %v329_v4  ;;  %s537_s17 = scalar_lea.sflag [#allocation4], %s1034_s19  ;;  %s798_s18 = scalar_lea.vmem %s552_s30, 128 }
  0x50   : > { %v528_v40 = vunpack.c.0.s8 %v527_v39  ;;  %p799_p11 = scmp.ne.s32.totalorder %s552_s30, %s798_s18  ;;  %p1141_p13 = scmp.ne.s32.totalorder %s1135_s22, 0 }
  0x51   : > { %s874_s10 = smov [#allocation7]  }
  0x52   : > { %v531_v41 = vsub.s32 %v528_v40, %v342_v10  ;;  %p800_p10 = pnand %p799_p11, %p1141_p13  ;;  %s802_s28 = sshll.u32 %s874_s10, 4  ;;  %s803_s28 = int_to_ptr.vmem [resolvable:$false] %s802_s28 }
  0x53   : > { %s804_s20 = scalar_lea.vmem %s803_s28, 256  ;;  %p805_p2 = scmp.lt.s32.totalorder %s552_s30, %s803_s28 }
  0x54   : > { %p801_p1 = pneg %p800_p10  ;;  %p806_p0 = scmp.lt.s32.totalorder %s804_s20, %s798_s18 }
  0x56   : > { %p807_p3 = por %p806_p0, %p805_p2 }
  0x58   : > { %p808_p12 = pnand %p807_p3, %p801_p1 }
  0x65   : > { %338 = vperm.xlu0 %738, %v333_v8  }
  0xd8   : > { %v331_v13 = vpop.xlane.xlu0 %330 }
  0xd9   : > { %v332_v14 = vmul.f32 0.00390625, %v331_v13 }
  0xdb   : > { %v352_v15 = vrot.slane %v332_v14, %v351_v12 }
  0xdd   : > { %670 = vmatmul.mubr.msk.f32.vlgmr.msra.gmra.mxu0 %vm353_vm2, %v352_v15 }
  0xe0   : > { %v339_v18 = vpop.permute.xlu0 %338 }
  0xe1   : > { %v344_v19 = vrot.slane %v339_v18, %v343_v17 }
  0xe3   : > { %v345_v21 = vmul.f32 %v344_v19, %v335_v20 }
 0x19d   : > { %v425_v22 = vpop.f32.mrf.mxu0 }
 0x19e   : > { %v426_v24 = vadd.f32 %v425_v22, %v345_v21 }
 0x19f   : > { %v671_v25 = vpop.f32.mrf.mxu0 }
 0x1a0   : > { %v430_v26 = vadd.f32 %v429_v23, %v426_v24 }
 0x1a2   : > { %v432_v27 = vmul.f32 0.01, %v430_v26  ;;  %vm431_vm3 = vcmp.gt.f32.partialorder %v430_v26, 0.0 }
 0x1a4   : > { %v433_v28 = vsel %vm431_vm3, %v430_v26, %v432_v27 }
 0x1a5   : > { %675 = vmatmul.mubr.msk.f32.vlgmr.msra.gmra.mxu1 %vm353_vm2, %v433_v28 }
 0x265   : > { %v508_v30 = vpop.f32.mrf.mxu1 }
 0x266   : > { %v509_v31 = vadd.f32 %v508_v30, %v435_v29 }
 0x267   : > { %v676_v32 = vpop.f32.mrf.mxu1 }
 0x268   : > { %v655_v33 = vmul.f32 -1.442695, %v509_v31 }
 0x26a   : > { %740 = vpow2.f32 %v655_v33 }
 0x277   : > { %v741_v34 = vpop.eup %740 }
 0x278   : > { %v515_v35 = vadd.f32 1.0, %v741_v34 }
 0x27a   : > { %742 = vrcp.f32 %v515_v35 }
 0x287   : > { %v743_v36 = vpop.eup %742 }
 0x288   : > { %v521_v37 = vrot.slane %v743_v36, %v343_v17 }
 0x28a   : > { %523 = vbcast.lane.b32.xlu1 %v521_v37, 256 }
 0x2fc   : > { %v524_v42 = vpop.permute.xlu1 %523 }
 0x2fd   : > { %v532_v43 = vrot.slane %v524_v42, %v531_v41 }
 0x2ff   : > { %v534_v44 = vmul.f32 %v532_v43, %v1048_v0 }
 0x301   : > { %535 = vst [vmem:[%s318_s21] sm:$0xff] %v534_v44 }
 0x302   : > { %811 = shalt.err (!%p808_p12)
}
 0x303   : > { %s812_s13 = scalar_lea.hbm %s549_s16, 128  ;;  %s816_s29 = scalar_lea.hbm %s1121_s7, 256 }
 0x304   : > { %p813_p5 = scmp.ne.s32.totalorder %s549_s16, %s812_s13  ;;  %p817_p6 = scmp.lt.s32.totalorder %s549_s16, %s1121_s7 }
 0x305   : > { %p818_p8 = scmp.lt.s32.totalorder %s816_s29, %s812_s13 }
 0x306   : > { %p814_p7 = pnand %p813_p5, %p1141_p13 }
 0x307   : > { %p819_p9 = por %p818_p8, %p817_p6 }
 0x308   : > { %p815_p4 = pneg %p814_p7 }
 0x30a   : > { %p820_p11 = pnand %p819_p9, %p815_p4 }
 0x30c   : > { %823 = shalt.err (!%p820_p11)
}
 0x30d   : > { %683 = dma.vmem_to_hbm [thread:$0]  (%p1141_p13), %s552_s30, 128, %s549_s16, %s537_s17  }
 0x30e PF: > { %s563_s3 = sand.u32 1, %s854_s24   ;;  %p1142_p10 = scmp.ne.s32.totalorder %s1128_s8, 0 }
 0x30f   : > { %p1143_p1 = scmp.ge.s32.totalorder %s866_s27, 2  ;;  %s564_s21 = scalar_lea.sflag [#allocation4], %s563_s3 }
 0x311   : > { %p694_p2 = pnand %p1143_p1, %p1142_p10 }
 0x313   : > { %p695_p0 = pneg %p694_p2 }
 0x315   : > { %849 = dma.done.wait (%p695_p0), %s564_s21, 128  }
 0x316   : > { %851 = vsyncadd (%p695_p0), %s564_s21, 4294967168  ;;  %s1144_s9 = sld [smem:[#allocation11_spill]]  ;;  %p21_p3 = scmp.ge.s32.totalorder %s963_s12, 4  }
 0x317   : > { %s1145_s24 = smov %s858_s25  ;;  %s1146_s25 = smov %s862_s26 }
 0x318   : > { %s1148_s27 = smov %s963_s12  ;;  %23 = sbr.rel (!%p21_p3) target bundleno = 8 (0x8), region = 100 }
 0x31c   : > { %s1147_s26 = smov %s1144_s9 }
 0x31d   :  { %569 = vsyncpa [#allocation3], 1 }
 0x31e   :  { %571 = vsyncpa [#allocation3 + $0x1], 1 }
 0x31f   :  { %572 = vsyncpa [#allocation6], 1 }
 0x320   :  { %573 = vsyncpa [#allocation4], 1 }
 0x321   :  { %575 = vsyncpa [#allocation4 + $0x1], 1 }

</bundles_post_ra>
